<compile_context>
chip_gen: v7x
topology: tpu7x:2x2x1
jax: 0.10.0
libtpu: 0.0.40
codegen_flags: <defaults>
</compile_context>

<pallas_src>
import jax
import jax.numpy as jnp
from jax import lax
from jax.experimental import pallas as pl
from jax.experimental.pallas import tpu as pltpu


def _cdiv(a, b):
    return -(-a // b)


def _round_up(v, m):
    return _cdiv(v, m) * m


def _choose_batch_tile(batch):
    """Batch tile: full-extent block for small batches, else 128-multiple tiles sized
    for >= ~4 grid steps (megacore sharding on v7x), capped at 2048 rows."""
    if batch <= 1024:
        return batch
    tb = _round_up(_cdiv(batch, 4), 128)
    return max(128, min(2048, tb))


def mlp_kernel(x_ref, w1_ref, b1_ref, w2_ref, b2_ref, w3_ref, b3_ref, o_ref):
    """Fused 3-layer MLP with ReLU for one (TB, state_dim) batch tile.

    Weights/biases are full-extent VMEM-resident blocks (constant index maps).
    The last layer is computed transposed so the store is a lane-dense
    (out_dim, TB) block — no zero-padded writeback.
    """
    x = x_ref[...]  # (TB, state_dim) f32

    # Layer 1: (TB, D) @ (D, 24) + (1, 24) -> ReLU
    h1 = jnp.dot(x, w1_ref[...], preferred_element_type=jnp.float32) + b1_ref[...]
    h1 = jnp.maximum(h1, 0.0)

    # Layer 2: (TB, 24) @ (24, 12) + (1, 12) -> ReLU
    h2 = jnp.dot(h1, w2_ref[...], preferred_element_type=jnp.float32) + b2_ref[...]
    h2 = jnp.maximum(h2, 0.0)

    # Layer 3 (transposed / NT): (out_dim, 12) x (TB, 12) contracted on the feature
    # dim -> (out_dim, TB).  Bias is (out_dim, 1) and broadcasts along lanes.
    out_t = lax.dot_general(
        w3_ref[...], h2,
        dimension_numbers=(((1,), (1,)), ((), ())),
        preferred_element_type=jnp.float32,
    ) + b3_ref[...]

    o_ref[...] = out_t.astype(o_ref.dtype)  # lane-dense (out_dim, TB) store


def _mlp_pallas_call(x, params):
    B, D = x.shape
    w1, b1 = params["w1"], params["b1"]
    w2, b2 = params["w2"], params["b2"]
    w3, b3 = params["w3"], params["b3"]
    out_dim = w3.shape[0]  # w3 stored (out, in); do not hardcode 2

    TB = _choose_batch_tile(B)
    grid = (_cdiv(B, TB),)  # no batch padding: Pallas clips the ragged last block

    def const_spec(a):  # full-extent, VMEM-resident across all grid steps
        return pl.BlockSpec(a.shape, lambda i: (0,) * a.ndim)

    return pl.pallas_call(
        mlp_kernel,
        out_shape=jax.ShapeDtypeStruct((out_dim, B), jnp.float32),
        grid=grid,
        in_specs=[
            pl.BlockSpec((TB, D), lambda i: (i, 0)),
            const_spec(w1), const_spec(b1),
            const_spec(w2), const_spec(b2),
            const_spec(w3), const_spec(b3),
        ],
        out_specs=pl.BlockSpec((out_dim, TB), lambda i: (0, i)),
        compiler_params=pltpu.CompilerParams(
            dimension_semantics=("parallel",),  # shard batch tiles across TCs on v7x
        ),
    )(x, w1, b1, w2, b2, w3, b3)


@jax.jit
def mlp_forward(x, params):
    """x: (B, state_dim) f32 -> (B, out_dim). Single jitted dispatch: the pallas_call
    plus the tiny (out_dim, B) -> (B, out_dim) transpose of the result."""
    out_t = _mlp_pallas_call(x, params)
    return out_t.T


def init_params(key, state_dim):
    """Deterministic init mirroring nn.Linear's uniform(-1/sqrt(fan_in), 1/sqrt(fan_in)).

    Stored directly in kernel layouts (done once, outside the hot path):
      w1: (state_dim, 24), b1: (1, 24)
      w2: (24, 12),        b2: (1, 12)
      w3: (2, 12)  [PyTorch-native (out, in)], b3: (2, 1)
    """
    def linear(k, fan_in, fan_out):
        kw, kb = jax.random.split(k)
        bound = 1.0 / (fan_in ** 0.5)
        w = jax.random.uniform(kw, (fan_in, fan_out), jnp.float32, -bound, bound)
        b = jax.random.uniform(kb, (fan_out,), jnp.float32, -bound, bound)
        return w, b

    k1, k2, k3 = jax.random.split(key, 3)
    w1, b1 = linear(k1, state_dim, 24)
    w2, b2 = linear(k2, 24, 12)
    w3, b3 = linear(k3, 12, 2)
    return {
        "w1": w1, "b1": b1.reshape(1, 24),
        "w2": w2, "b2": b2.reshape(1, 12),
        "w3": w3.T, "b3": b3.reshape(2, 1),
    }


def reference_forward(x, params):
    """Plain-JAX reference of the same forward pass, for sanity checking."""
    h = jnp.maximum(x @ params["w1"] + params["b1"], 0.0)
    h = jnp.maximum(h @ params["w2"] + params["b2"], 0.0)
    return h @ params["w3"].T + params["b3"].reshape(1, -1)


if __name__ == "__main__":
    STATE_DIM = 8   # len(gm.getState()) — synthetic choice for the flappy-bird state vector
    BATCH = 4       # realistic per-frame inference batch

    key = jax.random.PRNGKey(0)
    key, kx = jax.random.split(key)
    x = jax.random.normal(kx, (BATCH, STATE_DIM), jnp.float32)
    params = init_params(key, STATE_DIM)

    out = jax.block_until_ready(mlp_forward(x, params))
    ref = reference_forward(x, params)
    assert out.shape == (BATCH, 2), out.shape
    assert jnp.allclose(out, ref, atol=1e-4, rtol=1e-4), (out, ref)

    # Medium, non-multiple batch: single full-extent block path.
    key, kx2 = jax.random.split(key)
    x_med = jax.random.normal(kx2, (300, STATE_DIM), jnp.float32)
    out_med = jax.block_until_ready(mlp_forward(x_med, params))
    ref_med = reference_forward(x_med, params)
    assert out_med.shape == (300, 2), out_med.shape
    assert jnp.allclose(out_med, ref_med, atol=1e-4, rtol=1e-4)

    # Large, non-multiple batch: multi-step grid with a ragged (clipped) last tile.
    key, kx3 = jax.random.split(key)
    x_big = jax.random.normal(kx3, (2600, STATE_DIM), jnp.float32)
    out_big = jax.block_until_ready(mlp_forward(x_big, params))
    ref_big = reference_forward(x_big, params)
    assert out_big.shape == (2600, 2), out_big.shape
    assert jnp.allclose(out_big, ref_big, atol=1e-4, rtol=1e-4)

    print("KERNEL_OK")
</pallas_src>

<mosaic_0001>
module attributes {stable_mosaic.version = 11 : i64} {
  func.func @mlp_kernel(%arg0: i32, %arg1: memref<4x8xf32, #tpu.memory_space<vmem>>, %arg2: memref<8x24xf32, #tpu.memory_space<vmem>>, %arg3: memref<1x24xf32, #tpu.memory_space<vmem>>, %arg4: memref<24x12xf32, #tpu.memory_space<vmem>>, %arg5: memref<1x12xf32, #tpu.memory_space<vmem>>, %arg6: memref<2x12xf32, #tpu.memory_space<vmem>>, %arg7: memref<2x1xf32, #tpu.memory_space<vmem>>, %arg8: memref<2x4xf32, #tpu.memory_space<vmem>>) attributes {dimension_semantics = [#tpu.dimension_semantics<parallel>], iteration_bounds = array<i64: 1>, scalar_prefetch = 0 : i64, scratch_operands = 0 : i64, tpu.core_type = #tpu.core_type<tc>, window_params = [{transform_indices = @transform_0, window_bounds = array<i64: 4, 8>}, {pipeline_mode = #tpu.pipeline_mode<synchronous>, transform_indices = @transform_1, window_bounds = array<i64: 8, 24>}, {pipeline_mode = #tpu.pipeline_mode<synchronous>, transform_indices = @transform_2, window_bounds = array<i64: 1, 24>}, {pipeline_mode = #tpu.pipeline_mode<synchronous>, transform_indices = @transform_3, window_bounds = array<i64: 24, 12>}, {pipeline_mode = #tpu.pipeline_mode<synchronous>, transform_indices = @transform_4, window_bounds = array<i64: 1, 12>}, {pipeline_mode = #tpu.pipeline_mode<synchronous>, transform_indices = @transform_5, window_bounds = array<i64: 2, 12>}, {pipeline_mode = #tpu.pipeline_mode<synchronous>, transform_indices = @transform_6, window_bounds = array<i64: 2, 1>}, {transform_indices = @transform_7, window_bounds = array<i64: 2, 4>}]} {
    %c0 = arith.constant 0 : index
    %c0_0 = arith.constant 0 : index
    %0 = vector.load %arg1[%c0, %c0_0] : memref<4x8xf32, #tpu.memory_space<vmem>>, vector<4x8xf32>
    %c0_1 = arith.constant 0 : index
    %c0_2 = arith.constant 0 : index
    %1 = vector.load %arg2[%c0_1, %c0_2] : memref<8x24xf32, #tpu.memory_space<vmem>>, vector<8x24xf32>
    %cst = arith.constant dense<0.000000e+00> : vector<4x24xf32>
    %2 = tpu.matmul %0, %1, %cst {dimension_numbers = #tpu.dot_dimension_numbers<[1], [0], [0], [1], [0, 0, 1, 1], [], []>} : vector<4x8xf32>, vector<8x24xf32>, vector<4x24xf32> -> vector<4x24xf32>
    %c0_3 = arith.constant 0 : index
    %c0_4 = arith.constant 0 : index
    %3 = vector.load %arg3[%c0_3, %c0_4] : memref<1x24xf32, #tpu.memory_space<vmem>>, vector<1x24xf32>
    %4 = vector.broadcast %3 : vector<1x24xf32> to vector<4x24xf32>
    %5 = arith.addf %2, %4 : vector<4x24xf32>
    %cst_5 = arith.constant 0.000000e+00 : f32
    %6 = vector.broadcast %cst_5 : f32 to vector<4x24xf32>
    %7 = arith.maximumf %5, %6 : vector<4x24xf32>
    %c0_6 = arith.constant 0 : index
    %c0_7 = arith.constant 0 : index
    %8 = vector.load %arg4[%c0_6, %c0_7] : memref<24x12xf32, #tpu.memory_space<vmem>>, vector<24x12xf32>
    %cst_8 = arith.constant dense<0.000000e+00> : vector<4x12xf32>
    %9 = tpu.matmul %7, %8, %cst_8 {dimension_numbers = #tpu.dot_dimension_numbers<[1], [0], [0], [1], [0, 0, 1, 1], [], []>} : vector<4x24xf32>, vector<24x12xf32>, vector<4x12xf32> -> vector<4x12xf32>
    %c0_9 = arith.constant 0 : index
    %c0_10 = arith.constant 0 : index
    %10 = vector.load %arg5[%c0_9, %c0_10] : memref<1x12xf32, #tpu.memory_space<vmem>>, vector<1x12xf32>
    %11 = vector.broadcast %10 : vector<1x12xf32> to vector<4x12xf32>
    %12 = arith.addf %9, %11 : vector<4x12xf32>
    %cst_11 = arith.constant 0.000000e+00 : f32
    %13 = vector.broadcast %cst_11 : f32 to vector<4x12xf32>
    %14 = arith.maximumf %12, %13 : vector<4x12xf32>
    %c0_12 = arith.constant 0 : index
    %c0_13 = arith.constant 0 : index
    %15 = vector.load %arg6[%c0_12, %c0_13] : memref<2x12xf32, #tpu.memory_space<vmem>>, vector<2x12xf32>
    %cst_14 = arith.constant dense<0.000000e+00> : vector<2x4xf32>
    %16 = tpu.matmul %15, %14, %cst_14 {dimension_numbers = #tpu.dot_dimension_numbers<[1], [1], [0], [0], [0, 0, 1, 0], [], []>} : vector<2x12xf32>, vector<4x12xf32>, vector<2x4xf32> -> vector<2x4xf32>
    %c0_15 = arith.constant 0 : index
    %c0_16 = arith.constant 0 : index
    %17 = vector.load %arg7[%c0_15, %c0_16] : memref<2x1xf32, #tpu.memory_space<vmem>>, vector<2x1xf32>
    %18 = vector.broadcast %17 : vector<2x1xf32> to vector<2x4xf32>
    %19 = arith.addf %16, %18 : vector<2x4xf32>
    %c0_17 = arith.constant 0 : index
    %c0_18 = arith.constant 0 : index
    %20 = vector.load %arg8[%c0_17, %c0_18] : memref<2x4xf32, #tpu.memory_space<vmem>>, vector<2x4xf32>
    tpu.vector_store %arg8[%c0_17, %c0_18], %19 {strides = array<i32>} : memref<2x4xf32, #tpu.memory_space<vmem>>, vector<2x4xf32>,
    return
  }
  func.func @transform_0(%arg0: i32) -> (i32, i32) {
    %c0_i32 = arith.constant 0 : i32
    %c0_i32_0 = arith.constant 0 : i32
    return %arg0, %c0_i32 : i32, i32
  }
  func.func @transform_1(%arg0: i32) -> (i32, i32) {
    %c0_i32 = arith.constant 0 : i32
    %c0_i32_0 = arith.constant 0 : i32
    %c0_i32_1 = arith.constant 0 : i32
    return %c0_i32, %c0_i32_0 : i32, i32
  }
  func.func @transform_2(%arg0: i32) -> (i32, i32) {
    %c0_i32 = arith.constant 0 : i32
    %c0_i32_0 = arith.constant 0 : i32
    %c0_i32_1 = arith.constant 0 : i32
    return %c0_i32, %c0_i32_0 : i32, i32
  }
  func.func @transform_3(%arg0: i32) -> (i32, i32) {
    %c0_i32 = arith.constant 0 : i32
    %c0_i32_0 = arith.constant 0 : i32
    %c0_i32_1 = arith.constant 0 : i32
    return %c0_i32, %c0_i32_0 : i32, i32
  }
  func.func @transform_4(%arg0: i32) -> (i32, i32) {
    %c0_i32 = arith.constant 0 : i32
    %c0_i32_0 = arith.constant 0 : i32
    %c0_i32_1 = arith.constant 0 : i32
    return %c0_i32, %c0_i32_0 : i32, i32
  }
  func.func @transform_5(%arg0: i32) -> (i32, i32) {
    %c0_i32 = arith.constant 0 : i32
    %c0_i32_0 = arith.constant 0 : i32
    %c0_i32_1 = arith.constant 0 : i32
    return %c0_i32, %c0_i32_0 : i32, i32
  }
  func.func @transform_6(%arg0: i32) -> (i32, i32) {
    %c0_i32 = arith.constant 0 : i32
    %c0_i32_0 = arith.constant 0 : i32
    %c0_i32_1 = arith.constant 0 : i32
    return %c0_i32, %c0_i32_0 : i32, i32
  }
  func.func @transform_7(%arg0: i32) -> (i32, i32) {
    %c0_i32 = arith.constant 0 : i32
    %c0_i32_0 = arith.constant 0 : i32
    return %c0_i32, %arg0 : i32, i32
  }
}

</mosaic_0001>

<bundles_post_ra>
// kernel: mlp_forward.1
= control target key start
LH: loop header
LB: loop body
LE: loop exit
PB: predicated region body
PF: predicated region fallthrough
CT: control target
= control target key end

     0   :  { %vm36_vm0 = vcmask 64512   ;;  %v362_v2 = vmov 0.0   ;;  %vm363_vm1 = vmmov 0   ;;  %s446_s0 = inlined_call_operand.vmem [shape: f32[4,8], index: 0, kind: input, shape index: {}]   ;;  %s447_s1 = inlined_call_operand.vmem [shape: f32[8,24], index: 1, kind: input, shape index: {}]   ;;  %s448_s2 = inlined_call_operand.vmem [shape: f32[1,24], index: 2, kind: input, shape index: {}]   ;;  %s449_s3 = inlined_call_operand.vmem [shape: f32[24,12], index: 3, kind: input, shape index: {}]   ;;  %s450_s4 = inlined_call_operand.vmem [shape: f32[1,12], index: 4, kind: input, shape index: {}]   ;;  %s451_s5 = inlined_call_operand.vmem [shape: f32[2,12], index: 5, kind: input, shape index: {}]   ;;  %s452_s6 = inlined_call_operand.vmem [shape: f32[2,1], index: 6, kind: input, shape index: {}]   ;;  %s453_s7 = inlined_call_operand.hbm [shape: f32[2,4], index: 7, kind: output, shape index: {}]  }
   0x1   :  { %v28_v0 = vld [vmem:[%s447_s1] sm:$0xff]  ;;  %310 = vmatprep.subr.mxu0 %v362_v2  ;;  %312 = vmatprep.mubr.msk.f32.mxu0 %vm363_vm1, %v362_v2 }
   0x2   :  { %v27_v1 = vld [vmem:[%s446_s0] sm:$0xf] }
   0x3   :  { %12 = vsyncpa [#allocation3], 0  ;;  %311 = vmatpush3.msra.mxu0 %v28_v0  ;;  %v364_v3 = vmov 0.0|0.0   ;;  %321 = vmatprep.mubr.msk.f32.mxu1 %vm363_vm1, %v362_v2  ;;  %v111_v4 = vld [vmem:[%s449_s3] sm:$0xff]  ;;  %v112_v5 = vld [vmem:[%s449_s3 + $0x8] sm:$0xff]  ;;  %vm121_vm2 = vcmask 195584  }
   0x4   :  { %329 = vmatprep.subr.bf16.mxu1 %v364_v3  ;;  %313 = vmatmul.mubr.msk.f32.vlgmr.msra.gmra.mrb[0].mxu0 %vm36_vm0, %v27_v1  ;;  %v330_v6 = vpack.c.bf16 %v112_v5, %v111_v4  ;;  %v113_v7 = vld [vmem:[%s449_s3 + $0x10] sm:$0xff]  ;;  %v296_v8 = vld [vmem:[%s448_s2] ss:$0 sm:$0xff]  ;;  %v365_v14 = vmov 0   ;;  %vm203_vm3 = vcmask 97280   ;;  %vm280_vm4 = vcmask 25600  }
   0x5   :  { %324 = vmatprep.subr.mxu0 %v362_v2  ;;  %326 = vmatprep.mubr.msk.f32.mxu0 %vm363_vm1, %v362_v2  ;;  %v197_v13 = vld [vmem:[%s452_s6] sm:$0x3]  ;;  %s366_s6 = smov [#allocation2]  }
   0x6   :  { %331 = vmatpush3.bf16.msra.mxu1 %v330_v6  ;;  %337 = vset.pattern.permute.xlu0 %v365_v14  ;;  %v298_v15 = vld [vmem:[%s450_s4] ss:$0 sm:$0xff]  ;;  %s288_s15 = sshll.u32 %s366_s6, 4  ;;  %s289_s15 = int_to_ptr.vmem [resolvable:$true] %s288_s15 }
   0x7   :  { %319 = vmatprep.subr.mxu1 %v362_v2  ;;  %200 = vperm.xlu0 %337, %v197_v13   ;;  %v196_v20 = vld [vmem:[%s451_s5] sm:$0x3]  ;;  %s338_s4 = scalar_lea.vmem %s289_s15, 32  ;;  %p343_p1 = scmp.lt.s32.totalorder %s289_s15, %s289_s15 }
   0x8   :  { %p339_p0 = scmp.ne.s32.totalorder %s289_s15, %s338_s4  ;;  %p344_p2 = scmp.lt.s32.totalorder %s338_s4, %s338_s4 }
   0xa   :  { %320 = vmatpush3.msra.mxu1 %v113_v7  ;;  %p345_p3 = por %p344_p2, %p343_p1 }
   0xc   :  { %p346_p4 = pnand %p345_p3, %p339_p0 }
  0x86   :  { %v201_v21 = vpop.permute.xlu0 %200 }
  0xd7   :  { %v106_v9 = vpop.f32.mrb[0].mxu0 }
  0xd8   :  { %v107_v10 = vadd.f32 %v296_v8, %v106_v9  ;;  %v314_v11 = vpop.f32.mrb[1].mxu0 }
  0xda   :  { %v110_v12 = vmax.f32 %v107_v10, 0.0 }
  0xdc   :  { %322 = vmatmul.mubr.msk.f32.vlgmr.msra.gmra.mrb[0].mxu1 %vm121_vm2, %v110_v12 }
 0x1af   :  { %v191_v16 = vpop.f32.mrb[0].mxu1 }
 0x1b0   :  { %v192_v17 = vadd.f32 %v298_v15, %v191_v16  ;;  %v323_v18 = vpop.f32.mrb[1].mxu1 }
 0x1b2   :  { %v195_v19 = vmax.f32 %v192_v17, 0.0 }
 0x1b4   :  { %325 = vmatpush3.xpose.msk.msra.mxu0 %vm203_vm3, %v195_v19 }
 0x1b7   :  { %327 = vmatmul.mubr.msk.f32.vlgmr.msra.gmra.mrb[2].mxu0 %vm203_vm3, %v196_v20 }
 0x28a   :  { %v276_v22 = vpop.f32.mrb[2].mxu0 }
 0x28b   :  { %v277_v23 = vadd.f32 %v276_v22, %v201_v21  ;;  %v328_v24 = vpop.f32.mrb[3].mxu0 }
 0x28d   :  { %281 = vst.msk [vmem:[#allocation2] sm:$0x3] %vm280_vm4, %v277_v23 }
 0x28e   :  { %349 = shalt.err (!%p346_p4)
}
 0x28f   :  { %s350_s5 = scalar_lea.hbm %s453_s7, 32 }
 0x290   :  { %p351_p5 = scmp.ne.s32.totalorder %s453_s7, %s350_s5  ;;  %p354_p6 = scmp.lt.u32.totalorder %s350_s5, %s453_s7 }
 0x292   :  { %p356_p7 = pnand %p354_p6, %p351_p5 }
 0x294   :  { %359 = shalt.err (!%p356_p7)
}
 0x295   :  { %291 = dma.vmem_to_hbm [thread:$0]  %s289_s15, 32, %s453_s7, [#allocation3]  }
 0x296   :  { %360 = dma.done.wait [#allocation3], 32  }
 0x297   :  { %361 = vsyncadd [#allocation3], 4294967264 }
 0x298   :  { %295 = vsyncpa [#allocation3], 1 }

</bundles_post_ra>
